<compile_context>
chip_gen: v7x
topology: tpu7x:2x2x1
jax: 0.10.0
libtpu: 0.0.40
codegen_flags: <defaults>
</compile_context>

<pallas_src>
import functools
import math

import jax
import jax.numpy as jnp
from jax.experimental import pallas as pl
from jax.experimental.pallas import tpu as pltpu

_SIGMA = 1.5


def _gauss1d():
    w = [math.exp(-(v * v) / (2.0 * _SIGMA * _SIGMA)) for v in (-1.0, 0.0, 1.0)]
    s = sum(w)
    return [v / s for v in w]


_W1 = _gauss1d()                                                # [side, center, side]
_W3 = [[_W1[i] * _W1[j] for j in range(3)] for i in range(3)]   # 2-D kernel (reference)


def _blur_kernel(x_ref, o_ref, *, H, w_side, w_center):
    """Separable depthwise 3x3 Gaussian blur over a (C_blk*H, W) slab.

    Rows of several (H, W) images are stacked on the sublane axis; the
    per-image row masks below zero out the single row of cross-image leakage
    from the +-1 sublane rolls, so the result equals per-image zero-padded
    SAME convolution with the 3x3 Gaussian.
    """
    x = x_ref[...].astype(jnp.float32)
    R, W = x.shape

    # Hoisted boundary masks (built once per block).
    ri = jax.lax.broadcasted_iota(jnp.int32, (R, 1), 0)
    ci = jax.lax.broadcasted_iota(jnp.int32, (1, W), 1)
    li = ri % H                      # local row index inside each image
    up_ok = li >= 1                  # x[i-1, :] exists
    dn_ok = li <= H - 2              # x[i+1, :] exists
    lf_ok = ci >= 1                  # x[:, j-1] exists
    rt_ok = ci <= W - 2              # x[:, j+1] exists

    # W-pass (lane rolls).
    t = w_center * x
    t = t + w_side * jnp.where(lf_ok, pltpu.roll(x, shift=1, axis=1), 0.0)
    t = t + w_side * jnp.where(rt_ok, pltpu.roll(x, shift=W - 1, axis=1), 0.0)
    # H-pass (sublane rolls); cross-image rows are masked by up_ok / dn_ok.
    y = w_center * t
    y = y + w_side * jnp.where(up_ok, pltpu.roll(t, shift=1, axis=0), 0.0)
    y = y + w_side * jnp.where(dn_ok, pltpu.roll(t, shift=R - 1, axis=0), 0.0)

    o_ref[...] = y.astype(o_ref.dtype)


def _pick_c_blk(nc, h, w, sublane_mult, target_f32_bytes):
    """Largest divisor of nc whose (c_blk*h, w) block fits the f32 budget and
    keeps the sublane extent a multiple of the packing granularity (or full)."""
    per_image_f32 = h * w * 4
    candidates = [d for d in range(1, nc + 1)
                  if nc % d == 0 and ((d * h) % sublane_mult == 0 or d == nc)]
    within = [d for d in candidates if d * per_image_f32 <= target_f32_bytes]
    if within:
        return max(within)
    return min(candidates)   # even one image exceeds the budget: smallest legal block


def _blur_pallas(x, block_target_bytes=2 << 20):
    """Depthwise 3x3 Gaussian blur of an NCHW tensor via a Pallas TPU kernel."""
    N, C, H, W = x.shape
    NC = N * C
    sublane_mult = {4: 8, 2: 16, 1: 32}.get(jnp.dtype(x.dtype).itemsize, 8)
    c_blk = _pick_c_blk(NC, H, W, sublane_mult, block_target_bytes)
    rows_blk = c_blk * H

    x2 = x.reshape(NC * H, W)          # pure metadata reshape in XLA
    kernel = functools.partial(_blur_kernel, H=H,
                               w_side=_W1[0], w_center=_W1[1])
    out2 = pl.pallas_call(
        kernel,
        out_shape=jax.ShapeDtypeStruct(x2.shape, x.dtype),
        grid=(NC // c_blk,),
        in_specs=[pl.BlockSpec((rows_blk, W), lambda i: (i, 0))],
        out_specs=pl.BlockSpec((rows_blk, W), lambda i: (i, 0)),
        compiler_params=pltpu.CompilerParams(
            dimension_semantics=("parallel",),
            vmem_limit_bytes=32 * 1024 * 1024),
    )(x2)
    return out2.reshape(N, C, H, W)


def random_apply(x, key, p):
    """RandomApply(fn=gaussian_blur3x3, p).forward(x).

    The single Bernoulli(p) draw is derived deterministically from `key`
    (PyTorch: apply fn iff random.random() <= p).  The identity branch does
    no HBM traffic at all: lax.cond skips the kernel entirely.
    """
    u = jax.random.uniform(key, (), dtype=jnp.float32)
    apply_fn = u <= jnp.float32(p)
    return jax.lax.cond(apply_fn, _blur_pallas, lambda t: t, x)


# ----------------------------- pure-JAX references -----------------------------

def _blur_reference(x):
    N, C, H, W = x.shape
    w = jnp.array(_W3, dtype=jnp.float32).reshape(1, 1, 3, 3)
    w = jnp.tile(w, (C, 1, 1, 1))      # depthwise
    out = jax.lax.conv_general_dilated(
        x.astype(jnp.float32), w,
        window_strides=(1, 1), padding="SAME",
        feature_group_count=C,
        dimension_numbers=("NCHW", "OIHW", "NCHW"),
        precision=jax.lax.Precision.HIGHEST)
    return out.astype(x.dtype)


def _reference(x, key, p):
    u = jax.random.uniform(key, (), dtype=jnp.float32)
    apply_fn = u <= jnp.float32(p)
    return jnp.where(apply_fn, _blur_reference(x).astype(jnp.float32),
                     x.astype(jnp.float32)).astype(x.dtype)


if __name__ == "__main__":
    key = jax.random.PRNGKey(0)
    k_x, k_u = jax.random.split(key)
    x = jax.random.normal(k_x, (2, 4, 16, 16), dtype=jnp.float32)

    # 1) The blur kernel itself (always exercises the Pallas path), one block.
    blurred = jax.block_until_ready(_blur_pallas(x))
    blurred_ref = jax.block_until_ready(_blur_reference(x))
    assert blurred.shape == x.shape and blurred.dtype == x.dtype
    assert jnp.allclose(blurred, blurred_ref, atol=1e-5, rtol=1e-5), "blur mismatch"

    # 1b) Multi-block grid path (tiny block budget -> c_blk=2, grid=(4,)).
    blurred_g = jax.block_until_ready(_blur_pallas(x, block_target_bytes=2048))
    assert jnp.allclose(blurred_g, blurred_ref, atol=1e-5, rtol=1e-5), "grid mismatch"

    # 2) Full RandomApply semantics for several p (identity branch and blur branch).
    for p in (0.0, 0.3, 1.0):
        out = jax.block_until_ready(random_apply(x, k_u, p))
        ref = jax.block_until_ready(_reference(x, k_u, p))
        assert out.shape == x.shape and out.dtype == x.dtype
        assert jnp.allclose(out, ref, atol=1e-5, rtol=1e-5), f"mismatch at p={p}"

    print("KERNEL_OK")
</pallas_src>

<mosaic_0001>
module attributes {stable_mosaic.version = 11 : i64} {
  func.func @_blur_kernel(%arg0: i32, %arg1: memref<128x16xf32, #tpu.memory_space<vmem>>, %arg2: memref<128x16xf32, #tpu.memory_space<vmem>>) attributes {dimension_semantics = [#tpu.dimension_semantics<parallel>], iteration_bounds = array<i64: 1>, scalar_prefetch = 0 : i64, scratch_operands = 0 : i64, tpu.core_type = #tpu.core_type<tc>, window_params = [{transform_indices = @transform_0, window_bounds = array<i64: 128, 16>}, {transform_indices = @transform_1, window_bounds = array<i64: 128, 16>}]} {
    %c0 = arith.constant 0 : index
    %c0_0 = arith.constant 0 : index
    %0 = vector.load %arg1[%c0, %c0_0] : memref<128x16xf32, #tpu.memory_space<vmem>>, vector<128x16xf32>
    %1 = tpu.iota {dimensions = array<i32: 0>} : vector<128x1xi32>
    %2 = tpu.iota {dimensions = array<i32: 1>} : vector<1x16xi32>
    %c16_i32 = arith.constant 16 : i32
    %c0_i32 = arith.constant 0 : i32
    %3 = arith.cmpi eq, %c16_i32, %c0_i32 : i32
    %c1_i32 = arith.constant 1 : i32
    %4 = arith.select %3, %c1_i32, %c16_i32 : i32
    %5 = vector.broadcast %4 : i32 to vector<128x1xi32>
    %6 = arith.remsi %1, %5 : vector<128x1xi32>
    %c0_i32_1 = arith.constant 0 : i32
    %7 = vector.broadcast %c0_i32_1 : i32 to vector<128x1xi32>
    %8 = arith.cmpi ne, %6, %7 : vector<128x1xi32>
    %c0_i32_2 = arith.constant 0 : i32
    %9 = vector.broadcast %c0_i32_2 : i32 to vector<128x1xi32>
    %10 = arith.cmpi slt, %6, %9 : vector<128x1xi32>
    %c0_i32_3 = arith.constant 0 : i32
    %11 = arith.cmpi slt, %4, %c0_i32_3 : i32
    %12 = vector.broadcast %11 : i1 to vector<128x1xi1>
    %13 = vector.broadcast %12 : vector<128x1xi1> to vector<128x1xi1>
    %14 = arith.xori %10, %13 : vector<128x1xi1>
    %15 = arith.andi %14, %8 : vector<128x1xi1>
    %16 = vector.broadcast %4 : i32 to vector<128x1xi32>
    %17 = arith.addi %6, %16 : vector<128x1xi32>
    %18 = arith.select %15, %17, %6 : vector<128x1xi1>, vector<128x1xi32>
    %c1_i32_4 = arith.constant 1 : i32
    %19 = vector.broadcast %c1_i32_4 : i32 to vector<128x1xi32>
    %20 = arith.cmpi sge, %18, %19 : vector<128x1xi32>
    %c14_i32 = arith.constant 14 : i32
    %21 = vector.broadcast %c14_i32 : i32 to vector<128x1xi32>
    %22 = arith.cmpi sle, %18, %21 : vector<128x1xi32>
    %c1_i32_5 = arith.constant 1 : i32
    %23 = vector.broadcast %c1_i32_5 : i32 to vector<1x16xi32>
    %24 = arith.cmpi sge, %2, %23 : vector<1x16xi32>
    %c14_i32_6 = arith.constant 14 : i32
    %25 = vector.broadcast %c14_i32_6 : i32 to vector<1x16xi32>
    %26 = arith.cmpi sle, %2, %25 : vector<1x16xi32>
    %cst = arith.constant 0.384397328 : f32
    %27 = vector.broadcast %cst : f32 to vector<128x16xf32>
    %28 = arith.mulf %27, %0 : vector<128x16xf32>
    %c1_i32_7 = arith.constant 1 : i32
    %29 = tpu.dynamic_rotate %0 by %c1_i32_7 dim 1 : vector<128x16xf32>, i32 -> vector<128x16xf32>
    %cst_8 = arith.constant 0.000000e+00 : f32
    %30 = vector.shape_cast %24 : vector<1x16xi1> to vector<1x16xi1>
    %31 = vector.broadcast %30 : vector<1x16xi1> to vector<128x16xi1>
    %32 = vector.broadcast %cst_8 : f32 to vector<128x16xf32>
    %33 = arith.select %31, %29, %32 : vector<128x16xi1>, vector<128x16xf32>
    %cst_9 = arith.constant 0.307801336 : f32
    %34 = vector.broadcast %cst_9 : f32 to vector<128x16xf32>
    %35 = arith.mulf %34, %33 : vector<128x16xf32>
    %36 = arith.addf %28, %35 : vector<128x16xf32>
    %c15_i32 = arith.constant 15 : i32
    %37 = tpu.dynamic_rotate %0 by %c15_i32 dim 1 : vector<128x16xf32>, i32 -> vector<128x16xf32>
    %cst_10 = arith.constant 0.000000e+00 : f32
    %38 = vector.shape_cast %26 : vector<1x16xi1> to vector<1x16xi1>
    %39 = vector.broadcast %38 : vector<1x16xi1> to vector<128x16xi1>
    %40 = vector.broadcast %cst_10 : f32 to vector<128x16xf32>
    %41 = arith.select %39, %37, %40 : vector<128x16xi1>, vector<128x16xf32>
    %cst_11 = arith.constant 0.307801336 : f32
    %42 = vector.broadcast %cst_11 : f32 to vector<128x16xf32>
    %43 = arith.mulf %42, %41 : vector<128x16xf32>
    %44 = arith.addf %36, %43 : vector<128x16xf32>
    %cst_12 = arith.constant 0.384397328 : f32
    %45 = vector.broadcast %cst_12 : f32 to vector<128x16xf32>
    %46 = arith.mulf %45, %44 : vector<128x16xf32>
    %c1_i32_13 = arith.constant 1 : i32
    %47 = tpu.dynamic_rotate %44 by %c1_i32_13 dim 0 : vector<128x16xf32>, i32 -> vector<128x16xf32>
    %cst_14 = arith.constant 0.000000e+00 : f32
    %48 = vector.shape_cast %20 : vector<128x1xi1> to vector<128x1xi1>
    %49 = vector.broadcast %48 : vector<128x1xi1> to vector<128x16xi1>
    %50 = vector.broadcast %cst_14 : f32 to vector<128x16xf32>
    %51 = arith.select %49, %47, %50 : vector<128x16xi1>, vector<128x16xf32>
    %cst_15 = arith.constant 0.307801336 : f32
    %52 = vector.broadcast %cst_15 : f32 to vector<128x16xf32>
    %53 = arith.mulf %52, %51 : vector<128x16xf32>
    %54 = arith.addf %46, %53 : vector<128x16xf32>
    %c127_i32 = arith.constant 127 : i32
    %55 = tpu.dynamic_rotate %44 by %c127_i32 dim 0 : vector<128x16xf32>, i32 -> vector<128x16xf32>
    %cst_16 = arith.constant 0.000000e+00 : f32
    %56 = vector.shape_cast %22 : vector<128x1xi1> to vector<128x1xi1>
    %57 = vector.broadcast %56 : vector<128x1xi1> to vector<128x16xi1>
    %58 = vector.broadcast %cst_16 : f32 to vector<128x16xf32>
    %59 = arith.select %57, %55, %58 : vector<128x16xi1>, vector<128x16xf32>
    %cst_17 = arith.constant 0.307801336 : f32
    %60 = vector.broadcast %cst_17 : f32 to vector<128x16xf32>
    %61 = arith.mulf %60, %59 : vector<128x16xf32>
    %62 = arith.addf %54, %61 : vector<128x16xf32>
    %c0_18 = arith.constant 0 : index
    %c0_19 = arith.constant 0 : index
    %63 = vector.load %arg2[%c0_18, %c0_19] : memref<128x16xf32, #tpu.memory_space<vmem>>, vector<128x16xf32>
    tpu.vector_store %arg2[%c0_18, %c0_19], %62 {strides = array<i32>} : memref<128x16xf32, #tpu.memory_space<vmem>>, vector<128x16xf32>,
    return
  }
  func.func @transform_0(%arg0: i32) -> (i32, i32) {
    %c0_i32 = arith.constant 0 : i32
    %c0_i32_0 = arith.constant 0 : i32
    return %arg0, %c0_i32 : i32, i32
  }
  func.func @transform_1(%arg0: i32) -> (i32, i32) {
    %c0_i32 = arith.constant 0 : i32
    %c0_i32_0 = arith.constant 0 : i32
    return %arg0, %c0_i32 : i32, i32
  }
}

</mosaic_0001>

<bundles_post_ra>
// kernel: tpu_custom_call.1
= control target key start
LH: loop header
LB: loop body
LE: loop exit
PB: predicated region body
PF: predicated region fallthrough
CT: control target
= control target key end

     0   :  { %s860_s10 = smov 16   ;;  %vm285_vm0 = vcmask 1047680   ;;  %vm836_vm7 = vcmask 130048   ;;  %s1603_s0 = inlined_call_operand.vmem [shape: f32[128,16], index: 0, kind: input, shape index: {}]   ;;  %s1604_s1 = inlined_call_operand.vmem [shape: f32[128,16], index: 1, kind: output, shape index: {}]  }
   0x1   :  { %v876_v0 = vld [vmem:[%s1603_s0] sm:$0xff]  ;;  %v881_v1 = vld [vmem:[%s1603_s0 + $0x10] sm:$0xff]  ;;  %v890_v2 = vld [vmem:[%s1603_s0 + $0x8] sm:$0xff] }
   0x2   :  { %286 = vrot.lane.b32.xlu0 %v876_v0, %s860_s10  ;;  %292 = vrot.lane.b32.xlu1 %v881_v1, %s860_s10  ;;  %v895_v3 = vld [vmem:[%s1603_s0 + $0x18] sm:$0xff]  ;;  %v904_v4 = vld [vmem:[%s1603_s0 + $0x20] sm:$0xff] }
   0x3   :  { %v909_v5 = vld [vmem:[%s1603_s0 + $0x28] sm:$0xff]  ;;  %v918_v6 = vld [vmem:[%s1603_s0 + $0x30] sm:$0xff]  ;;  %v923_v7 = vld [vmem:[%s1603_s0 + $0x38] sm:$0xff] }
   0x4   :  { %v932_v8 = vld [vmem:[%s1603_s0 + $0x40] sm:$0xff]  ;;  %v937_v9 = vld [vmem:[%s1603_s0 + $0x48] sm:$0xff]  ;;  %v946_v10 = vld [vmem:[%s1603_s0 + $0x50] sm:$0xff] }
   0x5   :  { %v951_v11 = vld [vmem:[%s1603_s0 + $0x58] sm:$0xff]  ;;  %v960_v12 = vld [vmem:[%s1603_s0 + $0x60] sm:$0xff]  ;;  %v965_v13 = vld [vmem:[%s1603_s0 + $0x68] sm:$0xff] }
   0x6   :  { %289 = vrot.lane.b32.xlu0 %v890_v2, %s860_s10  ;;  %295 = vrot.lane.b32.xlu1 %v895_v3, %s860_s10  ;;  %v974_v14 = vld [vmem:[%s1603_s0 + $0x70] sm:$0xff]  ;;  %v979_v15 = vld [vmem:[%s1603_s0 + $0x78] sm:$0xff]  ;;  %s861_s0 = smov 113  }
   0xa   :  { %298 = vrot.lane.b32.xlu0 %v904_v4, %s860_s10  ;;  %301 = vrot.lane.b32.xlu1 %v909_v5, %s860_s10 }
   0xe   :  { %304 = vrot.lane.b32.xlu0 %v918_v6, %s860_s10  ;;  %307 = vrot.lane.b32.xlu1 %v923_v7, %s860_s10 }
  0x12   :  { %310 = vrot.lane.b32.xlu0 %v932_v8, %s860_s10  ;;  %313 = vrot.lane.b32.xlu1 %v937_v9, %s860_s10 }
  0x16   :  { %316 = vrot.lane.b32.xlu0 %v946_v10, %s860_s10  ;;  %319 = vrot.lane.b32.xlu1 %v951_v11, %s860_s10 }
  0x1a   :  { %322 = vrot.lane.b32.xlu0 %v960_v12, %s860_s10  ;;  %325 = vrot.lane.b32.xlu1 %v965_v13, %s860_s10 }
  0x1e   :  { %328 = vrot.lane.b32.xlu0 %v974_v14, %s860_s10  ;;  %331 = vrot.lane.b32.xlu1 %v979_v15, %s860_s10 }
  0x74   :  { %v287_v16 = vpop.permute.xlu0 %286  ;;  %v293_v17 = vpop.permute.xlu1 %292 }
  0x75   :  { %v288_v18 = vsel %vm285_vm0, %v287_v16, %v876_v0  ;;  %v294_v19 = vsel %vm285_vm0, %v293_v17, %v881_v1 }
  0x76   :  { %334 = vrot.lane.b32.xlu0 %v288_v18, %s860_s10 }
  0x78   :  { %v290_v20 = vpop.permute.xlu0 %289  ;;  %v296_v21 = vpop.permute.xlu1 %295 }
  0x79   :  { %v291_v22 = vsel %vm285_vm0, %v290_v20, %v890_v2  ;;  %v297_v23 = vsel %vm285_vm0, %v296_v21, %v895_v3 }
  0x7a   :  { %338 = vrot.lane.b32.xlu0 %v294_v19, %s860_s10  ;;  %336 = vrot.lane.b32.xlu1 %v291_v22, %s860_s10 }
  0x7c   :  { %v299_v24 = vpop.permute.xlu0 %298  ;;  %v302_v25 = vpop.permute.xlu1 %301 }
  0x7d   :  { %v300_v26 = vsel %vm285_vm0, %v299_v24, %v904_v4  ;;  %v303_v27 = vsel %vm285_vm0, %v302_v25, %v909_v5 }
  0x7e   :  { %340 = vrot.lane.b32.xlu1 %v297_v23, %s860_s10  ;;  %342 = vrot.lane.b32.xlu0 %v300_v26, %s860_s10 }
  0x80   :  { %v305_v28 = vpop.permute.xlu0 %304  ;;  %v308_v29 = vpop.permute.xlu1 %307 }
  0x81   :  { %v306_v30 = vsel %vm285_vm0, %v305_v28, %v918_v6  ;;  %v309_v31 = vsel %vm285_vm0, %v308_v29, %v923_v7 }
  0x82   :  { %344 = vrot.lane.b32.xlu1 %v303_v27, %s860_s10  ;;  %346 = vrot.lane.b32.xlu0 %v306_v30, %s860_s10 }
  0x84   :  { %v311_v32 = vpop.permute.xlu0 %310  ;;  %v314_v33 = vpop.permute.xlu1 %313 }
  0x85   :  { %v312_v34 = vsel %vm285_vm0, %v311_v32, %v932_v8  ;;  %v315_v35 = vsel %vm285_vm0, %v314_v33, %v937_v9 }
  0x86   :  { %348 = vrot.lane.b32.xlu1 %v309_v31, %s860_s10  ;;  %350 = vrot.lane.b32.xlu0 %v312_v34, %s860_s10 }
  0x88   :  { %v317_v36 = vpop.permute.xlu0 %316  ;;  %v320_v37 = vpop.permute.xlu1 %319 }
  0x89   :  { %v318_v38 = vsel %vm285_vm0, %v317_v36, %v946_v10  ;;  %v321_v39 = vsel %vm285_vm0, %v320_v37, %v951_v11  ;;  %v24_v37 = vlaneseq }
  0x8a   :  { %352 = vrot.lane.b32.xlu1 %v315_v35, %s860_s10  ;;  %354 = vrot.lane.b32.xlu0 %v318_v38, %s860_s10 }
  0x8c   :  { %v323_v40 = vpop.permute.xlu0 %322  ;;  %v326_v41 = vpop.permute.xlu1 %325 }
  0x8d   :  { %v324_v42 = vsel %vm285_vm0, %v323_v40, %v960_v12  ;;  %v327_v43 = vsel %vm285_vm0, %v326_v41, %v965_v13  ;;  %v1086_v40 = vmul.f32 0.38439733, %v876_v0  ;;  %v1088_v41 = vand.u32 127, %v24_v37 }
  0x8e   :  { %356 = vrot.lane.b32.xlu1 %v321_v39, %s860_s10  ;;  %358 = vrot.lane.b32.xlu0 %v324_v42, %s860_s10  ;;  %v1091_v42 = vmul.f32 0.38439733, %v890_v2 }
  0x8f   :  { %vm267_vm1 = vcmp.ge.s32.totalorder %v1088_v41, 1  ;;  %vm268_vm2 = vcmp.le.s32.totalorder %v1088_v41, 14 }
  0x90   :  { %v329_v44 = vpop.permute.xlu0 %328  ;;  %v332_v45 = vpop.permute.xlu1 %331 }
  0x91   :  { %v330_v46 = vsel %vm285_vm0, %v329_v44, %v974_v14  ;;  %v333_v47 = vsel %vm285_vm0, %v332_v45, %v979_v15  ;;  %v1096_v44 = vshrl.u32 %v24_v37, 7  ;;  %v1099_v45 = vmul.f32 0.38439733, %v895_v3 }
  0x92   :  { %360 = vrot.lane.b32.xlu1 %v327_v43, %s860_s10  ;;  %362 = vrot.lane.b32.xlu0 %v330_v46, %s860_s10  ;;  %v1094_v43 = vmul.f32 0.38439733, %v881_v1  ;;  %v1102_v46 = vmul.f32 0.38439733, %v904_v4 }
  0x93   :  { %vm626_vm3 = vcmp.lt.s32.totalorder %v1096_v44, 1  ;;  %vm739_vm4 = vcmp.lt.s32.totalorder %v1096_v44, 7 }
  0x96   :  { %364 = vrot.lane.b32.xlu1 %v333_v47, %s860_s10  ;;  %s862_s10 = smov 127   ;;  %v1105_v47 = vmul.f32 0.38439733, %v909_v5 }
  0xe8   :  { %v335_v48 = vpop.permute.xlu0 %334 }
  0xe9   :  { %v366_v49 = vsel %vm285_vm0, %v335_v48, %v876_v0 }
  0xea   :  { %400 = vrot.lane.b32.xlu0 %v366_v49, %s861_s0 }
  0xec   :  { %v337_v50 = vpop.permute.xlu1 %336  ;;  %v339_v51 = vpop.permute.xlu0 %338 }
  0xed   :  { %v367_v52 = vsel %vm285_vm0, %v337_v50, %v890_v2  ;;  %v368_v53 = vsel %vm285_vm0, %v339_v51, %v881_v1  ;;  %v1110_v2 = vmul.f32 0.38439733, %v918_v6  ;;  %v1113_v1 = vmul.f32 0.38439733, %v923_v7 }
  0xee   :  { %402 = vrot.lane.b32.xlu1 %v367_v52, %s861_s0  ;;  %404 = vrot.lane.b32.xlu0 %v368_v53, %s861_s0  ;;  %v1128_v50 = vmul.f32 0.38439733, %v960_v12  ;;  %v1141_v51 = vmul.f32 0.38439733, %v965_v13 }
  0xf0   :  { %v341_v54 = vpop.permute.xlu1 %340  ;;  %v343_v55 = vpop.permute.xlu0 %342 }
  0xf1   :  { %v369_v56 = vsel %vm285_vm0, %v341_v54, %v895_v3  ;;  %v370_v57 = vsel %vm285_vm0, %v343_v55, %v904_v4  ;;  %v1119_v3 = vmul.f32 0.38439733, %v937_v9  ;;  %v1122_v4 = vmul.f32 0.38439733, %v946_v10 }
  0xf2   :  { %406 = vrot.lane.b32.xlu1 %v369_v56, %s861_s0  ;;  %408 = vrot.lane.b32.xlu0 %v370_v57, %s861_s0  ;;  %v1156_v54 = vadd.s32 48, %v1096_v44  ;;  %v1159_v55 = vadd.s32 56, %v1096_v44 }
  0xf4   :  { %v345_v58 = vpop.permute.xlu1 %344  ;;  %v347_v59 = vpop.permute.xlu0 %346 }
  0xf5   :  { %v371_v60 = vsel %vm285_vm0, %v345_v58, %v909_v5  ;;  %v372_v61 = vsel %vm285_vm0, %v347_v59, %v918_v6  ;;  %v1125_v5 = vmul.f32 0.38439733, %v951_v11  ;;  %v1131_v6 = vadd.s32 8, %v1096_v44 }
  0xf6   :  { %410 = vrot.lane.b32.xlu1 %v371_v60, %s861_s0  ;;  %412 = vrot.lane.b32.xlu0 %v372_v61, %s861_s0  ;;  %v1175_v59 = vadd.s32 88, %v1096_v44 }
  0xf8   :  { %v349_v62 = vpop.permute.xlu1 %348  ;;  %v351_v63 = vpop.permute.xlu0 %350 }
  0xf9   :  { %v373_v16 = vsel %vm285_vm0, %v349_v62, %v923_v7  ;;  %v374_v17 = vsel %vm285_vm0, %v351_v63, %v932_v8  ;;  %v1134_v7 = vadd.s32 16, %v1096_v44 }
  0xfa   :  { %414 = vrot.lane.b32.xlu1 %v373_v16, %s861_s0  ;;  %416 = vrot.lane.b32.xlu0 %v374_v17, %s861_s0 }
  0xfc   :  { %v353_v18 = vpop.permute.xlu1 %352  ;;  %v355_v19 = vpop.permute.xlu0 %354 }
  0xfd   :  { %v375_v20 = vsel %vm285_vm0, %v353_v18, %v937_v9  ;;  %v376_v21 = vsel %vm285_vm0, %v355_v19, %v946_v10  ;;  %v89_v19 = vand.u32 15, %v1156_v54 }
  0xfe   :  { %418 = vrot.lane.b32.xlu1 %v375_v20, %s861_s0  ;;  %420 = vrot.lane.b32.xlu0 %v376_v21, %s861_s0 }
  0xff   :  { %vm1336_vm10 = vcmp.ge.s32.totalorder %v89_v19, 1 }
 0x100   :  { %v357_v22 = vpop.permute.xlu1 %356  ;;  %v359_v23 = vpop.permute.xlu0 %358 }
 0x101   :  { %v377_v24 = vsel %vm285_vm0, %v357_v22, %v951_v11  ;;  %v378_v25 = vsel %vm285_vm0, %v359_v23, %v960_v12  ;;  %v1144_v11 = vmul.f32 0.38439733, %v974_v14  ;;  %v1147_v12 = vadd.s32 32, %v1096_v44 }
 0x102   :  { %422 = vrot.lane.b32.xlu1 %v377_v24, %s861_s0  ;;  %424 = vrot.lane.b32.xlu0 %v378_v25, %s861_s0 }
 0x103   :  { %v75_v63 = vand.u32 15, %v1147_v12 }
 0x104   :  { %v361_v26 = vpop.permute.xlu1 %360  ;;  %v363_v27 = vpop.permute.xlu0 %362 }
 0x105   :  { %v379_v28 = vsel %vm285_vm0, %v361_v26, %v965_v13  ;;  %v380_v29 = vsel %vm285_vm0, %v363_v27, %v974_v14  ;;  %v1163_v13 = vadd.s32 64, %v1096_v44  ;;  %v1166_v14 = vadd.s32 72, %v1096_v44 }
 0x106   :  { %426 = vrot.lane.b32.xlu1 %v379_v28, %s861_s0  ;;  %428 = vrot.lane.b32.xlu0 %v380_v29, %s861_s0  ;;  %vm1299_vm8 = vcmp.ge.s32.totalorder %v75_v63, 1 }
 0x108   :  { %v365_v30 = vpop.permute.xlu1 %364 }
 0x109   :  { %v381_v31 = vsel %vm285_vm0, %v365_v30, %v979_v15 }
 0x10a   :  { %430 = vrot.lane.b32.xlu1 %v381_v31, %s861_s0  ;;  %498 = vrot.lane.b32.xlu0 %v366_v49, %s862_s10  ;;  %v1116_v49 = vmul.f32 0.38439733, %v932_v8  ;;  %v1137_v8 = vadd.s32 24, %v1096_v44 }
 0x10c   :  { %v68_v58 = vand.u32 15, %v1137_v8 }
 0x10e   :  { %500 = vrot.lane.b32.xlu1 %v367_v52, %s862_s10  ;;  %502 = vrot.lane.b32.xlu0 %v368_v53, %s862_s10  ;;  %v1150_v52 = vmul.f32 0.38439733, %v979_v15  ;;  %v1153_v53 = vadd.s32 40, %v1096_v44  ;;  %v1169_v15 = vadd.s32 80, %v1096_v44  ;;  %vm1305_vm9 = vcmp.le.s32.totalorder %v68_v58, 14 }
 0x110   :  { %v82_v18 = vand.u32 15, %v1153_v53 }
 0x112   :  { %504 = vrot.lane.b32.xlu1 %v369_v56, %s862_s10  ;;  %506 = vrot.lane.b32.xlu0 %v370_v57, %s862_s10  ;;  %v54_v56 = vand.u32 15, %v1131_v6  ;;  %v61_v57 = vand.u32 15, %v1134_v7  ;;  %vm1342_vm11 = vcmp.le.s32.totalorder %v82_v18, 14 }
 0x114   :  { %vm1242_vm5 = vcmp.ge.s32.totalorder %v61_v57, 1  ;;  %vm1246_vm6 = vcmp.le.s32.totalorder %v54_v56, 14 }
 0x116   :  { %508 = vrot.lane.b32.xlu1 %v371_v60, %s862_s10  ;;  %510 = vrot.lane.b32.xlu0 %v372_v61, %s862_s10 }
 0x11a   :  { %512 = vrot.lane.b32.xlu1 %v373_v16, %s862_s10  ;;  %514 = vrot.lane.b32.xlu0 %v374_v17, %s862_s10  ;;  %v1181_v16 = vadd.s32 96, %v1096_v44  ;;  %v1184_v17 = vadd.s32 104, %v1096_v44 }
 0x11e   :  { %516 = vrot.lane.b32.xlu1 %v375_v20, %s862_s10  ;;  %518 = vrot.lane.b32.xlu0 %v376_v21, %s862_s10  ;;  %v1190_v21 = vadd.s32 112, %v1096_v44 }
 0x122   :  { %520 = vrot.lane.b32.xlu1 %v377_v24, %s862_s10  ;;  %522 = vrot.lane.b32.xlu0 %v378_v25, %s862_s10  ;;  %v1196_v25 = vadd.s32 120, %v1096_v44 }
 0x124   :  { %v152_v6 = vand.u32 15, %v1196_v25 }
 0x126   :  { %524 = vrot.lane.b32.xlu1 %v379_v28, %s862_s10  ;;  %526 = vrot.lane.b32.xlu0 %v380_v29, %s862_s10 }
 0x12a   :  { %528 = vrot.lane.b32.xlu1 %v381_v31, %s862_s10 }
 0x15c   :  { %v401_v32 = vpop.permute.xlu0 %400 }
 0x15d   :  { %v448_v60 = vsel %vm267_vm1, %v401_v32, 0.0 }
 0x15e   :  { %v464_v26 = vmul.f32 0.30780134, %v448_v60 }
 0x160   :  { %v403_v33 = vpop.permute.xlu1 %402  ;;  %v405_v34 = vpop.permute.xlu0 %404  ;;  %v480_v7 = vadd.f32 %v464_v26, %v1086_v40 }
 0x161   :  { %v449_v27 = vsel %vm267_vm1, %v403_v33, 0.0  ;;  %v450_v28 = vsel %vm267_vm1, %v405_v34, 0.0 }
 0x162   :  { %v465_v29 = vmul.f32 0.30780134, %v449_v27 }
 0x164   :  { %v407_v35 = vpop.permute.xlu1 %406  ;;  %v409_v36 = vpop.permute.xlu0 %408 }
 0x165   :  { %v451_v30 = vsel %vm267_vm1, %v407_v35, 0.0  ;;  %v452_v31 = vsel %vm267_vm1, %v409_v36, 0.0  ;;  %v466_v36 = vmul.f32 0.30780134, %v450_v28 }
 0x166   :  { %v467_v24 = vmul.f32 0.30780134, %v451_v30  ;;  %v468_v20 = vmul.f32 0.30780134, %v452_v31  ;;  %v481_v30 = vadd.f32 %v465_v29, %v1091_v42 }
 0x168   :  { %v1081_v38 = vpop.permute.xlu1 %410  ;;  %v1083_v39 = vpop.permute.xlu0 %412 }
 0x169   :  { %v453_v33 = vsel %vm267_vm1, %v1081_v38, 0.0  ;;  %v454_v34 = vsel %vm267_vm1, %v1083_v39, 0.0 }
 0x16a   :  { %v469_v39 = vmul.f32 0.30780134, %v453_v33  ;;  %v470_v22 = vmul.f32 0.30780134, %v454_v34 }
 0x16c   :  { %v415_v0 = vpop.permute.xlu1 %414  ;;  %v1107_v48 = vpop.permute.xlu0 %416  ;;  %v1251_v42 = vadd.f32 %v469_v39, %v1105_v47 }
 0x16d   :  { %v455_v23 = vsel %vm267_vm1, %v415_v0, 0.0  ;;  %v456_v38 = vsel %vm267_vm1, %v1107_v48, 0.0 }
 0x16e   :  { %v471_v60 = vmul.f32 0.30780134, %v455_v23  ;;  %v472_v31 = vmul.f32 0.30780134, %v456_v38  ;;  %v483_v23 = vadd.f32 %v467_v24, %v1099_v45  ;;  %v1256_v24 = vadd.f32 %v470_v22, %v1110_v2 }
 0x170   :  { %v419_v9 = vpop.permute.xlu1 %418  ;;  %v421_v10 = vpop.permute.xlu0 %420  ;;  %v1259_v57 = vadd.f32 %v471_v60, %v1113_v1 }
 0x171   :  { %v457_v35 = vsel %vm267_vm1, %v419_v9, 0.0  ;;  %v458_v27 = vsel %vm267_vm1, %v421_v10, 0.0  ;;  %v482_v9 = vadd.f32 %v466_v36, %v1094_v43 }
 0x172   :  { %v473_v33 = vmul.f32 0.30780134, %v457_v35  ;;  %v1266_v35 = vadd.f32 %v472_v31, %v1116_v49 }
 0x174   :  { %v423_v61 = vpop.permute.xlu1 %422  ;;  %v425_v62 = vpop.permute.xlu0 %424  ;;  %v1273_v2 = vadd.f32 %v473_v33, %v1119_v3 }
 0x175   :  { %v459_v40 = vsel %vm267_vm1, %v423_v61, 0.0  ;;  %v460_v26 = vsel %vm267_vm1, %v425_v62, 0.0  ;;  %v1240_v61 = vadd.f32 %v468_v20, %v1102_v46  ;;  %v474_v62 = vmul.f32 0.30780134, %v458_v27 }
 0x176   :  { %v475_v43 = vmul.f32 0.30780134, %v459_v40  ;;  %v476_v29 = vmul.f32 0.30780134, %v460_v26 }
 0x177   :  { %v1276_v1 = vadd.f32 %v474_v62, %v1122_v4 }
 0x178   :  { %v427_v32 = vpop.permute.xlu1 %426  ;;  %v429_v37 = vpop.permute.xlu0 %428  ;;  %v1279_v39 = vadd.f32 %v475_v43, %v1125_v5  ;;  %v1282_v49 = vadd.f32 %v476_v29, %v1128_v50 }
 0x179   :  { %v461_v45 = vsel %vm267_vm1, %v427_v32, 0.0  ;;  %v462_v32 = vsel %vm267_vm1, %v429_v37, 0.0 }
 0x17a   :  { %v477_v22 = vmul.f32 0.30780134, %v461_v45  ;;  %v1288_v40 = vmul.f32 0.30780134, %v462_v32 }
 0x17c   :  { %v431_v28 = vpop.permute.xlu1 %430  ;;  %v499_v0 = vpop.permute.xlu0 %498 }
 0x17d   :  { %v546_v48 = vsel %vm268_vm2, %v499_v0, 0.0  ;;  %v463_v37 = vsel %vm267_vm1, %v431_v28, 0.0 }
 0x17e   :  { %v562_v10 = vmul.f32 0.30780134, %v546_v48  ;;  %v1312_v33 = vmul.f32 0.30780134, %v463_v37 }
 0x180   :  { %v501_v46 = vpop.permute.xlu1 %500  ;;  %v503_v20 = vpop.permute.xlu0 %502  ;;  %v1270_v36 = vadd.f32 %v562_v10, %v480_v7  ;;  %v1310_v10 = vadd.f32 %v477_v22, %v1141_v51 }
 0x181   :  { %v547_v56 = vsel %vm268_vm2, %v501_v46, 0.0  ;;  %v548_v47 = vsel %vm268_vm2, %v503_v20, 0.0 }
 0x182   :  { %v563_v38 = vmul.f32 0.30780134, %v547_v56  ;;  %v564_v60 = vmul.f32 0.30780134, %v548_v47  ;;  %v610_v50 = vrot.slane %v1270_v36, 7 }
 0x184   :  { %v1286_v7 = vadd.f32 %v563_v38, %v481_v30  ;;  %v505_v27 = vpop.permute.xlu1 %504  ;;  %v507_v3 = vpop.permute.xlu0 %506  ;;  %v580_v4 = vadd.f32 %v564_v60, %v482_v9 }
 0x185   :  { %v549_v26 = vsel %vm268_vm2, %v505_v27, 0.0  ;;  %v550_v5 = vsel %vm268_vm2, %v507_v3, 0.0 }
 0x186   :  { %v611_v48 = vrot.slane %v1286_v7, 7  ;;  %v724_v28 = vrot.slane %v1286_v7, 1  ;;  %v565_v30 = vmul.f32 0.30780134, %v549_v26  ;;  %v612_v62 = vrot.slane %v580_v4, 7 }
 0x187   :  { %v725_v43 = vrot.slane %v580_v4, 1  ;;  %v595_v29 = vmul.f32 0.38439733, %v1286_v7  ;;  %v566_v8 = vmul.f32 0.30780134, %v550_v5 }
 0x188   :  { %v641_v12 = vsel %vm626_vm3, %v610_v50, %v611_v48  ;;  %v581_v63 = vadd.f32 %v565_v30, %v483_v23  ;;  %v509_v58 = vpop.permute.xlu1 %508  ;;  %v511_v45 = vpop.permute.xlu0 %510  ;;  %v596_v20 = vmul.f32 0.38439733, %v580_v4  ;;  %v640_v51 = vsel %vm626_vm3, %v611_v48, %v612_v62 }
 0x189   :  { %v692_v46 = vmul.f32 0.30780134, %v641_v12  ;;  %v753_v56 = vsel %vm739_vm4, %v724_v28, %v725_v43  ;;  %v677_v47 = vsel %vm1242_vm5, %v640_v51, 0.0  ;;  %v582_v4 = vadd.f32 %v566_v8, %v1240_v61 }
 0x18a   :  { %v789_v32 = vsel %vm1246_vm6, %v753_v56, 0.0  ;;  %v597_v23 = vmul.f32 0.38439733, %v581_v63  ;;  %v613_v38 = vrot.slane %v581_v63, 7  ;;  %v693_v60 = vmul.f32 0.30780134, %v677_v47 }
 0x18b   :  { %v708_v22 = vadd.f32 %v692_v46, %v595_v29  ;;  %v805_v37 = vmul.f32 0.30780134, %v789_v32  ;;  %v726_v27 = vrot.slane %v581_v63, 1  ;;  %v551_v26 = vsel %vm268_vm2, %v509_v58, 0.0 }
 0x18c   :  { %v639_v3 = vsel %vm626_vm3, %v612_v62, %v613_v38  ;;  %v552_v5 = vsel %vm268_vm2, %v511_v45, 0.0  ;;  %v513_v48 = vpop.permute.xlu1 %512  ;;  %v709_v61 = vadd.f32 %v693_v60, %v596_v20  ;;  %v598_v29 = vmul.f32 0.38439733, %v582_v4  ;;  %v515_v8 = vpop.permute.xlu0 %514 }
 0x18d   :  { %v821_v30 = vadd.f32 %v805_v37, %v708_v22  ;;  %v694_v62 = vmul.f32 0.30780134, %v639_v3  ;;  %v752_v54 = vsel %vm739_vm4, %v725_v43, %v726_v27  ;;  %v614_v12 = vrot.slane %v582_v4, 7 }
 0x18e   :  { %v806_v19 = vmul.f32 0.30780134, %v752_v54  ;;  %v727_v63 = vrot.slane %v582_v4, 1  ;;  %v567_v18 = vmul.f32 0.30780134, %v551_v26  ;;  %v553_v45 = vsel %vm268_vm2, %v513_v48, 0.0 }
 0x18f   :  { %838 = vst.msk [vmem:[%s1604_s1 + $0x8] sm:$0xff] %vm836_vm7, %v821_v30  ;;  %v710_v53 = vadd.f32 %v694_v62, %v597_v23  ;;  %v568_v58 = vmul.f32 0.30780134, %v552_v5  ;;  %v638_v43 = vsel %vm626_vm3, %v613_v38, %v614_v12  ;;  %v569_v51 = vmul.f32 0.30780134, %v553_v45 }
 0x190   :  { %v822_v46 = vadd.f32 %v806_v19, %v709_v61  ;;  %v751_v20 = vsel %vm739_vm4, %v726_v27, %v727_v63  ;;  %v679_v56 = vsel %vm1299_vm8, %v638_v43, 0.0  ;;  %v583_v32 = vadd.f32 %v567_v18, %v1251_v42  ;;  %v517_v37 = vpop.permute.xlu1 %516  ;;  %v519_v48 = vpop.permute.xlu0 %518 }
 0x191   :  { %v791_v47 = vsel %vm1305_vm9, %v751_v20, 0.0  ;;  %v584_v23 = vadd.f32 %v568_v58, %v1256_v24  ;;  %v695_v38 = vmul.f32 0.30780134, %v679_v56  ;;  %v1371_v60 = vadd.f32 %v569_v51, %v1259_v57 }
 0x192   :  { %839 = vst.msk [vmem:[%s1604_s1 + $0x10] sm:$0xff] %vm836_vm7, %v822_v46  ;;  %v807_v22 = vmul.f32 0.30780134, %v791_v47  ;;  %v554_v31 = vsel %vm268_vm2, %v515_v8, 0.0  ;;  %v599_v9 = vmul.f32 0.38439733, %v583_v32 }
 0x193   :  { %v615_v27 = vrot.slane %v583_v32, 7  ;;  %v728_v3 = vrot.slane %v583_v32, 1  ;;  %v600_v42 = vmul.f32 0.38439733, %v584_v23  ;;  %v711_v4 = vadd.f32 %v695_v38, %v598_v29 }
 0x194   :  { %v823_v24 = vadd.f32 %v807_v22, %v710_v53  ;;  %v616_v26 = vrot.slane %v584_v23, 7  ;;  %v729_v5 = vrot.slane %v584_v23, 1  ;;  %v601_v30 = vmul.f32 0.38439733, %v1371_v60  ;;  %v521_v56 = vpop.permute.xlu1 %520 }
 0x195   :  { %v637_v61 = vsel %vm626_vm3, %v614_v12, %v615_v27  ;;  %v750_v57 = vsel %vm739_vm4, %v727_v63, %v728_v3  ;;  %v617_v62 = vrot.slane %v1371_v60, 7  ;;  %v1617_v54 = vand.u32 15, %v1163_v13 }
 0x196   :  { %v1620_v29 = vand.u32 15, %v1159_v55  ;;  %840 = vst.msk [vmem:[%s1604_s1 + $0x18] sm:$0xff] %vm836_vm7, %v823_v24  ;;  %v696_v12 = vmul.f32 0.30780134, %v637_v61  ;;  %v808_v63 = vmul.f32 0.30780134, %v750_v57  ;;  %v636_v13 = vsel %vm626_vm3, %v615_v27, %v616_v26 }
 0x197   :  { %vm1383_vm12 = vcmp.ge.s32.totalorder %v1617_v54, 1  ;;  %v749_v53 = vsel %vm739_vm4, %v728_v3, %v729_v5  ;;  %v681_v55 = vsel %vm1336_vm10, %v636_v13, 0.0  ;;  %v635_v58 = vsel %vm626_vm3, %v616_v26, %v617_v62 }
 0x198   :  { %vm1389_vm13 = vcmp.le.s32.totalorder %v1620_v29, 14  ;;  %v793_v18 = vsel %vm1342_vm11, %v749_v53, 0.0  ;;  %v730_v45 = vrot.slane %v1371_v60, 1  ;;  %v712_v46 = vadd.f32 %v696_v12, %v599_v9  ;;  %v525_v8 = vpop.permute.xlu1 %524 }
 0x199   :  { %v824_v43 = vadd.f32 %v808_v63, %v711_v4  ;;  %v697_v20 = vmul.f32 0.30780134, %v681_v55  ;;  %v809_v51 = vmul.f32 0.30780134, %v793_v18  ;;  %v698_v47 = vmul.f32 0.30780134, %v635_v58 }
 0x19a   :  { %v748_v32 = vsel %vm739_vm4, %v729_v5, %v730_v45  ;;  %v570_v23 = vmul.f32 0.30780134, %v554_v31  ;;  %v555_v34 = vsel %vm268_vm2, %v517_v37, 0.0  ;;  %v1623_v9 = vand.u32 15, %v1169_v15  ;;  %v523_v37 = vpop.permute.xlu0 %522 }
 0x19b   :  { %841 = vst.msk [vmem:[%s1604_s1 + $0x20] sm:$0xff] %vm836_vm7, %v824_v43  ;;  %v713_v0 = vadd.f32 %v697_v20, %v600_v42  ;;  %v825_v38 = vadd.f32 %v809_v51, %v712_v46  ;;  %v810_v22 = vmul.f32 0.30780134, %v748_v32  ;;  %v571_v60 = vmul.f32 0.30780134, %v555_v34 }
 0x19c   :  { %vm1418_vm14 = vcmp.ge.s32.totalorder %v1623_v9, 1  ;;  %v1626_v31 = vand.u32 15, %v1166_v14  ;;  %v714_v4 = vadd.f32 %v698_v47, %v601_v30  ;;  %v586_v24 = vadd.f32 %v570_v23, %v1266_v35 }
 0x19d   :  { %v556_v42 = vsel %vm268_vm2, %v519_v48, 0.0  ;;  %v557_v15 = vsel %vm268_vm2, %v521_v56, 0.0  ;;  %842 = vst.msk [vmem:[%s1604_s1 + $0x28] sm:$0xff] %vm836_vm7, %v825_v38  ;;  %v826_v14 = vadd.f32 %v810_v22, %v713_v0  ;;  %v587_v26 = vadd.f32 %v571_v60, %v1273_v2 }
 0x19e   :  { %vm1424_vm15 = vcmp.le.s32.totalorder %v1626_v31, 14  ;;  %v572_v5 = vmul.f32 0.30780134, %v556_v42  ;;  %v573_v61 = vmul.f32 0.30780134, %v557_v15  ;;  %v618_v30 = vrot.slane %v586_v24, 7 }
 0x19f   :  { %v602_v57 = vmul.f32 0.38439733, %v586_v24  ;;  %v731_v54 = vrot.slane %v586_v24, 1  ;;  %v558_v35 = vsel %vm268_vm2, %v523_v37, 0.0  ;;  %843 = vst.msk [vmem:[%s1604_s1 + $0x30] sm:$0xff] %vm836_vm7, %v826_v14  ;;  %v619_v29 = vrot.slane %v587_v26, 7 }
 0x1a0   :  { %v603_v48 = vmul.f32 0.38439733, %v587_v26  ;;  %v732_v12 = vrot.slane %v587_v26, 1  ;;  %v588_v63 = vadd.f32 %v572_v5, %v1276_v1  ;;  %v634_v2 = vsel %vm626_vm3, %v617_v62, %v618_v30 }
 0x1a1   :  { %v747_v13 = vsel %vm739_vm4, %v730_v45, %v731_v54  ;;  %v589_v53 = vadd.f32 %v573_v61, %v1279_v39  ;;  %v1629_v55 = vand.u32 15, %v1181_v16  ;;  %v1632_v58 = vand.u32 15, %v1175_v59 }
 0x1a2   :  { %v574_v1 = vmul.f32 0.30780134, %v558_v35  ;;  %v683_v62 = vsel %vm1383_vm12, %v634_v2, 0.0  ;;  %v795_v45 = vsel %vm1389_vm13, %v747_v13, 0.0  ;;  %v633_v16 = vsel %vm626_vm3, %v618_v30, %v619_v29 }
 0x1a3   :  { %vm1452_vm0 = vcmp.ge.s32.totalorder %v1629_v55, 1  ;;  %vm1458_vm1 = vcmp.le.s32.totalorder %v1632_v58, 14  ;;  %v746_v39 = vsel %vm739_vm4, %v731_v54, %v732_v12  ;;  %v494_v59 = vadd.f32 %v1288_v40, %v1144_v11 }
 0x1a4   :  { %v699_v43 = vmul.f32 0.30780134, %v683_v62  ;;  %v811_v20 = vmul.f32 0.30780134, %v795_v45  ;;  %v700_v51 = vmul.f32 0.30780134, %v633_v16  ;;  %v1473_v19 = vadd.f32 %v574_v1, %v1282_v49 }
 0x1a5   :  { %v812_v56 = vmul.f32 0.30780134, %v746_v39  ;;  %v620_v47 = vrot.slane %v588_v63, 7  ;;  %v733_v32 = vrot.slane %v588_v63, 1  ;;  %v604_v38 = vmul.f32 0.38439733, %v588_v63 }
 0x1a6   :  { %v715_v23 = vadd.f32 %v699_v43, %v602_v57  ;;  %v827_v34 = vadd.f32 %v811_v20, %v714_v4  ;;  %v716_v0 = vadd.f32 %v700_v51, %v603_v48  ;;  %v621_v40 = vrot.slane %v589_v53, 7  ;;  %v527_v4 = vpop.permute.xlu0 %526 }
 0x1a7   :  { %v632_v22 = vsel %vm626_vm3, %v619_v29, %v620_v47  ;;  %v745_v11 = vsel %vm739_vm4, %v732_v12, %v733_v32  ;;  %v734_v60 = vrot.slane %v589_v53, 1  ;;  %v605_v37 = vmul.f32 0.38439733, %v589_v53  ;;  %v529_v29 = vpop.permute.xlu1 %528 }
 0x1a8   :  { %844 = vst.msk [vmem:[%s1604_s1 + $0x38] sm:$0xff] %vm836_vm7, %v827_v34  ;;  %v828_v49 = vadd.f32 %v812_v56, %v715_v23  ;;  %v685_v9 = vsel %vm1418_vm14, %v632_v22, 0.0  ;;  %v797_v31 = vsel %vm1424_vm15, %v745_v11, 0.0  ;;  %v631_v15 = vsel %vm626_vm3, %v620_v47, %v621_v40 }
 0x1a9   :  { %v701_v24 = vmul.f32 0.30780134, %v685_v9  ;;  %v813_v42 = vmul.f32 0.30780134, %v797_v31  ;;  %v744_v14 = vsel %vm739_vm4, %v733_v32, %v734_v60  ;;  %v1635_v26 = vand.u32 15, %v1190_v21 }
 0x1aa   :  { %v1638_v27 = vand.u32 15, %v1184_v17  ;;  %845 = vst.msk [vmem:[%s1604_s1 + $0x40] sm:$0xff] %vm836_vm7, %v828_v49  ;;  %v702_v61 = vmul.f32 0.30780134, %v631_v15  ;;  %v814_v57 = vmul.f32 0.30780134, %v744_v14  ;;  %v495_v18 = vadd.f32 %v1312_v33, %v1150_v52 }
 0x1ab   :  { %vm1493_vm5 = vcmp.ge.s32.totalorder %v1635_v26, 1  ;;  %v622_v30 = vrot.slane %v1473_v19, 7  ;;  %v735_v21 = vrot.slane %v1473_v19, 1  ;;  %v717_v54 = vadd.f32 %v701_v24, %v604_v38 }
 0x1ac   :  { %vm1499_vm6 = vcmp.le.s32.totalorder %v1638_v27, 14  ;;  %v829_v35 = vadd.f32 %v813_v42, %v716_v0  ;;  %v559_v17 = vsel %vm268_vm2, %v525_v8, 0.0  ;;  %v560_v48 = vsel %vm268_vm2, %v527_v4, 0.0 }
 0x1ad   :  { %v718_v12 = vadd.f32 %v702_v61, %v605_v37  ;;  %v630_v63 = vsel %vm626_vm3, %v621_v40, %v622_v30  ;;  %v743_v2 = vsel %vm739_vm4, %v734_v60, %v735_v21  ;;  %v575_v13 = vmul.f32 0.30780134, %v559_v17 }
 0x1ae   :  { %846 = vst.msk [vmem:[%s1604_s1 + $0x48] sm:$0xff] %vm836_vm7, %v829_v35  ;;  %v830_v53 = vadd.f32 %v814_v57, %v717_v54  ;;  %v687_v55 = vsel %vm1452_vm0, %v630_v63, 0.0  ;;  %v799_v58 = vsel %vm1458_vm1, %v743_v2, 0.0  ;;  %v576_v1 = vmul.f32 0.30780134, %v560_v48 }
 0x1af   :  { %v1641_v62 = vand.u32 15, %v1096_v44  ;;  %v703_v16 = vmul.f32 0.30780134, %v687_v55  ;;  %v815_v39 = vmul.f32 0.30780134, %v799_v58  ;;  %v591_v43 = vadd.f32 %v575_v13, %v1310_v10 }
 0x1b0   :  { %v561_v20 = vsel %vm268_vm2, %v529_v29, 0.0  ;;  %847 = vst.msk [vmem:[%s1604_s1 + $0x50] sm:$0xff] %vm836_vm7, %v830_v53  ;;  %v592_v46 = vadd.f32 %v576_v1, %v494_v59  ;;  %vm1542_vm9 = vcmp.le.s32.totalorder %v152_v6, 14  ;;  %v594_v10 = vmul.f32 0.38439733, %v1270_v36 }
 0x1b1   :  { %vm1527_vm8 = vcmp.ge.s32.totalorder %v1641_v62, 1  ;;  %v577_v56 = vmul.f32 0.30780134, %v561_v20  ;;  %v606_v41 = vmul.f32 0.38439733, %v1473_v19  ;;  %v831_v47 = vadd.f32 %v815_v39, %v718_v12 }
 0x1b2   :  { %v623_v32 = vrot.slane %v591_v43, 7  ;;  %v723_v52 = vrot.slane %v1270_v36, 1  ;;  %v736_v33 = vrot.slane %v591_v43, 1  ;;  %v624_v8 = vrot.slane %v592_v46, 7 }
 0x1b3   :  { %v737_v23 = vrot.slane %v592_v46, 1  ;;  %v719_v34 = vadd.f32 %v703_v16, %v606_v41  ;;  %848 = vst.msk [vmem:[%s1604_s1 + $0x58] sm:$0xff] %vm836_vm7, %v831_v47  ;;  %v607_v25 = vmul.f32 0.38439733, %v591_v43  ;;  %v593_v59 = vadd.f32 %v577_v56, %v495_v18 }
 0x1b4   :  { %v629_v6 = vsel %vm626_vm3, %v622_v30, %v623_v32  ;;  %v742_v19 = vsel %vm739_vm4, %v735_v21, %v736_v33  ;;  %v628_v38 = vsel %vm626_vm3, %v623_v32, %v624_v8  ;;  %v608_v40 = vmul.f32 0.38439733, %v592_v46 }
 0x1b5   :  { %v704_v0 = vmul.f32 0.30780134, %v629_v6  ;;  %v741_v22 = vsel %vm739_vm4, %v736_v33, %v737_v23  ;;  %v816_v11 = vmul.f32 0.30780134, %v742_v19  ;;  %v689_v60 = vsel %vm1493_vm5, %v628_v38, 0.0 }
 0x1b6   :  { %v801_v49 = vsel %vm1499_vm6, %v741_v22, 0.0  ;;  %v705_v31 = vmul.f32 0.30780134, %v689_v60  ;;  %v625_v4 = vrot.slane %v593_v59, 7  ;;  %v754_v24 = vsel %vm739_vm4, %v723_v52, %v724_v28 }
 0x1b7   :  { %v720_v9 = vadd.f32 %v704_v0, %v607_v25  ;;  %v817_v37 = vmul.f32 0.30780134, %v801_v49  ;;  %v832_v42 = vadd.f32 %v816_v11, %v719_v34  ;;  %v609_v15 = vmul.f32 0.38439733, %v593_v59 }
 0x1b8   :  { %v738_v14 = vrot.slane %v593_v59, 1  ;;  %v721_v26 = vadd.f32 %v705_v31, %v608_v40  ;;  %v627_v5 = vsel %vm626_vm3, %v624_v8, %v625_v4  ;;  %v642_v3 = vsel %vm626_vm3, %v625_v4, %v610_v50 }
 0x1b9   :  { %v833_v27 = vadd.f32 %v817_v37, %v720_v9  ;;  %849 = vst.msk [vmem:[%s1604_s1 + $0x60] sm:$0xff] %vm836_vm7, %v832_v42  ;;  %v675_v7 = vsel %vm1527_vm8, %v642_v3, 0.0  ;;  %v706_v28 = vmul.f32 0.30780134, %v627_v5  ;;  %v804_v35 = vmul.f32 0.30780134, %v754_v24 }
 0x1ba   :  { %v740_v61 = vsel %vm739_vm4, %v737_v23, %v738_v14  ;;  %v755_v57 = vsel %vm739_vm4, %v738_v14, %v723_v52  ;;  %v691_v36 = vmul.f32 0.30780134, %v675_v7 }
 0x1bb   :  { %850 = vst.msk [vmem:[%s1604_s1 + $0x68] sm:$0xff] %vm836_vm7, %v833_v27  ;;  %v803_v50 = vsel %vm1542_vm9, %v755_v57, 0.0  ;;  %v818_v30 = vmul.f32 0.30780134, %v740_v61  ;;  %v722_v21 = vadd.f32 %v706_v28, %v609_v15 }
 0x1bc   :  { %v819_v54 = vmul.f32 0.30780134, %v803_v50  ;;  %v707_v17 = vadd.f32 %v691_v36, %v594_v10 }
 0x1bd   :  { %v834_v48 = vadd.f32 %v818_v30, %v721_v26 }
 0x1be   :  { %v835_v29 = vadd.f32 %v819_v54, %v722_v21  ;;  %v820_v12 = vadd.f32 %v804_v35, %v707_v17 }
 0x1bf   :  { %851 = vst.msk [vmem:[%s1604_s1 + $0x70] sm:$0xff] %vm836_vm7, %v834_v48 }
 0x1c0   :  { %852 = vst.msk [vmem:[%s1604_s1 + $0x78] sm:$0xff] %vm836_vm7, %v835_v29  ;;  %837 = vst.msk [vmem:[%s1604_s1] sm:$0xff] %vm836_vm7, %v820_v12 }

</bundles_post_ra>
